<compile_context>
chip_gen: v7x
topology: tpu7x:2x2x1
jax: 0.10.0
libtpu: 0.0.40
codegen_flags: <defaults>
</compile_context>

<pallas_src>
import jax
import jax.numpy as jnp
from jax.experimental import pallas as pl
from jax.experimental.pallas import tpu as pltpu

_LANE = 128
_PART_ELEMS = 8192      # max row_tile * acc_w kept live in vregs per grid step
_K_MAX = 64             # max lane-chunks reduced (statically unrolled) per grid step
_MAX_ROW_TILE = 32


def _round_up(x, m):
    return (x + m - 1) // m * m


def _normalize_mask(x):
    """Keep narrow integer masks as-is (no extra HBM pass for int32/int8/uint8)."""
    d = jnp.dtype(x.dtype)
    if d == jnp.bool_:
        return x.astype(jnp.int8)                       # cheap 1-byte transport
    if jnp.issubdtype(d, jnp.integer) and d.itemsize <= 4:
        return x                                        # stream caller's dtype directly
    return x.astype(jnp.int32)                          # float / int64 etc. -> `.int()`


def iou_metric(prd, tgt, *, eps=1e-6, reduction="none"):
    """Pallas implementation of IouMetric.forward.

    Args:
      prd: (B, C, H, W) integer/bool (0/1) predicted masks.
      tgt: (B, C, H, W) integer/bool (0/1) target masks.
    Returns:
      (C,) float32 for reduction='none', scalar for 'mean'/'sum'.
    """
    assert prd.shape == tgt.shape and prd.ndim == 4
    B, C, H, W = prd.shape
    R, hw_total = B * C, H * W

    # Free row-major reshape; no dtype cast / pad passes through HBM.
    prd2 = _normalize_mask(prd.reshape(R, hw_total))
    tgt2 = _normalize_mask(tgt.reshape(R, hw_total))

    itemsize = jnp.dtype(prd2.dtype).itemsize
    sub = 8 if itemsize == 4 else 32                    # sublane granularity

    # ---- tile sizing -------------------------------------------------------
    r_ceil = _round_up(R, sub)
    row_tile = min(r_ceil, _MAX_ROW_TILE)               # multiple of `sub`

    hw_lanes = _round_up(hw_total, _LANE)
    acc_w_cap = max(_LANE, (_PART_ELEMS // row_tile) // _LANE * _LANE)
    acc_w = min(hw_lanes, acc_w_cap)                    # lane-dense accumulator width

    K = min(_K_MAX, pl.cdiv(hw_total, acc_w))           # chunks per grid step
    tile_hw = K * acc_w                                 # spatial columns per grid step

    n_hw = pl.cdiv(hw_total, tile_hw)
    grid_r = pl.cdiv(R, row_tile)
    # Give the second TensorCore work even when B*C fits in one row block.
    n_seg = 2 if (grid_r == 1 and n_hw >= 2) else 1
    per_seg = pl.cdiv(n_hw, n_seg)
    need_mask = (n_seg * per_seg * tile_hw) != hw_total

    # ---- kernel ------------------------------------------------------------
    def kernel(prd_ref, tgt_ref, inter_ref, union_ref):
        h = pl.program_id(2)

        @pl.when(h == 0)
        def _init():
            inter_ref[...] = jnp.zeros_like(inter_ref)
            union_ref[...] = jnp.zeros_like(union_ref)

        if need_mask:
            base = (pl.program_id(0) * per_seg + h) * tile_hw
            lane_ids = jax.lax.broadcasted_iota(jnp.int32, (row_tile, acc_w), 1)

        # Reduce the whole (row_tile, tile_hw) tile into vreg-resident
        # (row_tile, acc_w) partials: pure elementwise VALU work, then one
        # RMW of the small resident output block per grid step.
        part_i = None
        part_u = None
        for k in range(K):
            p = prd_ref[:, k * acc_w:(k + 1) * acc_w]
            t = tgt_ref[:, k * acc_w:(k + 1) * acc_w]
            i_c = (p & t).astype(jnp.int32)              # AND/OR in narrow dtype,
            u_c = (p | t).astype(jnp.int32)              # widen results only
            if need_mask:
                valid = (lane_ids + (base + k * acc_w)) < hw_total
                i_c = jnp.where(valid, i_c, 0)
                u_c = jnp.where(valid, u_c, 0)
            if part_i is None:
                part_i, part_u = i_c, u_c
            else:
                part_i = part_i + i_c
                part_u = part_u + u_c

        inter_ref[...] += part_i
        union_ref[...] += part_u

    # ---- specs / grid ------------------------------------------------------
    if n_seg * per_seg == n_hw:
        def in_index(s, r, h):
            return (r, s * per_seg + h)
    else:
        # Odd split: clamp the block index; the kernel mask zeroes the
        # (fully out-of-range) contribution of the clamped re-read.
        def in_index(s, r, h):
            return (r, jnp.minimum(s * per_seg + h, n_hw - 1))

    in_spec = pl.BlockSpec((row_tile, tile_hw), in_index)
    out_spec = pl.BlockSpec((None, row_tile, acc_w), lambda s, r, h: (s, r, 0))
    out_rows = grid_r * row_tile

    inter_out, union_out = pl.pallas_call(
        kernel,
        out_shape=(
            jax.ShapeDtypeStruct((n_seg, out_rows, acc_w), jnp.int32),
            jax.ShapeDtypeStruct((n_seg, out_rows, acc_w), jnp.int32),
        ),
        grid_spec=pltpu.PrefetchScalarGridSpec(
            num_scalar_prefetch=0,
            grid=(n_seg, grid_r, per_seg),
            in_specs=[in_spec, in_spec],
            out_specs=(out_spec, out_spec),
        ),
        compiler_params=pltpu.CompilerParams(
            dimension_semantics=("parallel", "parallel", "arbitrary"),
            vmem_limit_bytes=32 * 1024 * 1024,
        ),
    )(prd2, tgt2)

    # ---- tiny epilogue in plain JAX (exact int32 counts, then float) -------
    inter = jnp.sum(inter_out, axis=(0, 2))[:R].astype(jnp.float32).reshape(B, C)
    union = jnp.sum(union_out, axis=(0, 2))[:R].astype(jnp.float32).reshape(B, C)
    iou_b = (inter + eps) / (union + eps)                # per (b, c)
    iou_score = jnp.mean(iou_b, axis=0)                  # (C,) == reduction='none'

    if reduction == "mean":
        return jnp.mean(iou_score)
    if reduction == "sum":
        return jnp.sum(iou_score)
    return iou_score


def _iou_reference(prd, tgt, eps=1e-6):
    """Pure-JAX reference mirroring the PyTorch module (reduction='none')."""
    prd = prd.astype(jnp.int32)
    tgt = tgt.astype(jnp.int32)
    inter = jnp.sum(prd & tgt, axis=(2, 3)).astype(jnp.float32)   # (B, C)
    union = jnp.sum(prd | tgt, axis=(2, 3)).astype(jnp.float32)   # (B, C)
    iou_b = (inter + eps) / (union + eps)
    return jnp.mean(iou_b, axis=0)                                # (C,)


if __name__ == "__main__":
    key = jax.random.PRNGKey(0)
    k1, k2, k3, k4 = jax.random.split(key, 4)

    # Case 1: nicely tiled shapes (B, C, H, W) = (2, 4, 16, 16), int32 masks.
    prd = jax.random.bernoulli(k1, 0.5, (2, 4, 16, 16)).astype(jnp.int32)
    tgt = jax.random.bernoulli(k2, 0.5, (2, 4, 16, 16)).astype(jnp.int32)
    out = jax.block_until_ready(iou_metric(prd, tgt, eps=1e-6, reduction="none"))
    ref = _iou_reference(prd, tgt)
    assert out.shape == (4,), out.shape
    assert jnp.allclose(out, ref, atol=1e-5, rtol=1e-5), (out, ref)

    # Case 2: ragged spatial size (exercises the in-kernel tail mask, no pad).
    prd2 = jax.random.bernoulli(k3, 0.3, (2, 3, 10, 10)).astype(jnp.int32)
    tgt2 = jax.random.bernoulli(k4, 0.6, (2, 3, 10, 10)).astype(jnp.int32)
    out2 = jax.block_until_ready(iou_metric(prd2, tgt2, eps=1e-6, reduction="none"))
    ref2 = _iou_reference(prd2, tgt2)
    assert out2.shape == (3,), out2.shape
    assert jnp.allclose(out2, ref2, atol=1e-5, rtol=1e-5), (out2, ref2)

    print("KERNEL_OK")
</pallas_src>

<mosaic_0001>
module attributes {stable_mosaic.version = 11 : i64} {
  func.func @kernel(%arg0: i32, %arg1: i32, %arg2: i32, %arg3: memref<8x256xi32, #tpu.memory_space<vmem>>, %arg4: memref<8x256xi32, #tpu.memory_space<vmem>>, %arg5: memref<1x8x256xi32, #tpu.memory_space<vmem>>, %arg6: memref<1x8x256xi32, #tpu.memory_space<vmem>>) attributes {dimension_semantics = [#tpu.dimension_semantics<parallel>, #tpu.dimension_semantics<parallel>, #tpu.dimension_semantics<arbitrary>], iteration_bounds = array<i64: 1, 1, 1>, scalar_prefetch = 0 : i64, scratch_operands = 0 : i64, tpu.core_type = #tpu.core_type<tc>, window_params = [{transform_indices = @transform_0, window_bounds = array<i64: 8, 256>}, {transform_indices = @transform_1, window_bounds = array<i64: 8, 256>}, {transform_indices = @transform_2, window_bounds = array<i64: 1, 8, 256>}, {transform_indices = @transform_3, window_bounds = array<i64: 1, 8, 256>}]} {
    %c0_i32 = arith.constant 0 : i32
    %0 = arith.cmpi eq, %arg2, %c0_i32 : i32
    %1 = arith.extui %0 : i1 to i32
    %c0_i32_0 = arith.constant 0 : i32
    %2 = arith.cmpi ne, %1, %c0_i32_0 : i32
    scf.if %2 {
      %c0_i32_16 = arith.constant 0 : i32
      %19 = vector.broadcast %c0_i32_16 : i32 to vector<8x256xi32>
      %c0_17 = arith.constant 0 : index
      %c0_18 = arith.constant 0 : index
      %c0_19 = arith.constant 0 : index
      %20 = vector.load %arg5[%c0_17, %c0_18, %c0_19] : memref<1x8x256xi32, #tpu.memory_space<vmem>>, vector<1x8x256xi32>
      %21 = vector.shape_cast %20 : vector<1x8x256xi32> to vector<8x256xi32>
      %22 = vector.shape_cast %19 : vector<8x256xi32> to vector<1x8x256xi32>
      tpu.vector_store %arg5[%c0_17, %c0_18, %c0_19], %22 {strides = array<i32>} : memref<1x8x256xi32, #tpu.memory_space<vmem>>, vector<1x8x256xi32>,
      %c0_i32_20 = arith.constant 0 : i32
      %23 = vector.broadcast %c0_i32_20 : i32 to vector<8x256xi32>
      %c0_21 = arith.constant 0 : index
      %c0_22 = arith.constant 0 : index
      %c0_23 = arith.constant 0 : index
      %24 = vector.load %arg6[%c0_21, %c0_22, %c0_23] : memref<1x8x256xi32, #tpu.memory_space<vmem>>, vector<1x8x256xi32>
      %25 = vector.shape_cast %24 : vector<1x8x256xi32> to vector<8x256xi32>
      %26 = vector.shape_cast %23 : vector<8x256xi32> to vector<1x8x256xi32>
      tpu.vector_store %arg6[%c0_21, %c0_22, %c0_23], %26 {strides = array<i32>} : memref<1x8x256xi32, #tpu.memory_space<vmem>>, vector<1x8x256xi32>,
    } else {
    }
    %c0 = arith.constant 0 : index
    %c0_1 = arith.constant 0 : index
    %3 = vector.load %arg3[%c0, %c0_1] : memref<8x256xi32, #tpu.memory_space<vmem>>, vector<8x256xi32>
    %c0_2 = arith.constant 0 : index
    %c0_3 = arith.constant 0 : index
    %4 = vector.load %arg4[%c0_2, %c0_3] : memref<8x256xi32, #tpu.memory_space<vmem>>, vector<8x256xi32>
    %5 = arith.andi %3, %4 : vector<8x256xi32>
    %6 = arith.ori %3, %4 : vector<8x256xi32>
    %c0_4 = arith.constant 0 : index
    %c0_5 = arith.constant 0 : index
    %c0_6 = arith.constant 0 : index
    %7 = vector.load %arg5[%c0_4, %c0_5, %c0_6] : memref<1x8x256xi32, #tpu.memory_space<vmem>>, vector<1x8x256xi32>
    %8 = vector.shape_cast %7 : vector<1x8x256xi32> to vector<8x256xi32>
    %9 = arith.addi %8, %5 : vector<8x256xi32>
    %c0_7 = arith.constant 0 : index
    %c0_8 = arith.constant 0 : index
    %c0_9 = arith.constant 0 : index
    %10 = vector.load %arg5[%c0_7, %c0_8, %c0_9] : memref<1x8x256xi32, #tpu.memory_space<vmem>>, vector<1x8x256xi32>
    %11 = vector.shape_cast %10 : vector<1x8x256xi32> to vector<8x256xi32>
    %12 = vector.shape_cast %9 : vector<8x256xi32> to vector<1x8x256xi32>
    tpu.vector_store %arg5[%c0_7, %c0_8, %c0_9], %12 {strides = array<i32>} : memref<1x8x256xi32, #tpu.memory_space<vmem>>, vector<1x8x256xi32>,
    %c0_10 = arith.constant 0 : index
    %c0_11 = arith.constant 0 : index
    %c0_12 = arith.constant 0 : index
    %13 = vector.load %arg6[%c0_10, %c0_11, %c0_12] : memref<1x8x256xi32, #tpu.memory_space<vmem>>, vector<1x8x256xi32>
    %14 = vector.shape_cast %13 : vector<1x8x256xi32> to vector<8x256xi32>
    %15 = arith.addi %14, %6 : vector<8x256xi32>
    %c0_13 = arith.constant 0 : index
    %c0_14 = arith.constant 0 : index
    %c0_15 = arith.constant 0 : index
    %16 = vector.load %arg6[%c0_13, %c0_14, %c0_15] : memref<1x8x256xi32, #tpu.memory_space<vmem>>, vector<1x8x256xi32>
    %17 = vector.shape_cast %16 : vector<1x8x256xi32> to vector<8x256xi32>
    %18 = vector.shape_cast %15 : vector<8x256xi32> to vector<1x8x256xi32>
    tpu.vector_store %arg6[%c0_13, %c0_14, %c0_15], %18 {strides = array<i32>} : memref<1x8x256xi32, #tpu.memory_space<vmem>>, vector<1x8x256xi32>,
    return
  }
  func.func @transform_0(%arg0: i32, %arg1: i32, %arg2: i32) -> (i32, i32) {
    %c1_i32 = arith.constant 1 : i32
    %0 = arith.muli %arg0, %c1_i32 : i32
    %1 = arith.addi %0, %arg2 : i32
    %c0_i32 = arith.constant 0 : i32
    return %arg1, %1 : i32, i32
  }
  func.func @transform_1(%arg0: i32, %arg1: i32, %arg2: i32) -> (i32, i32) {
    %c1_i32 = arith.constant 1 : i32
    %0 = arith.muli %arg0, %c1_i32 : i32
    %1 = arith.addi %0, %arg2 : i32
    %c0_i32 = arith.constant 0 : i32
    return %arg1, %1 : i32, i32
  }
  func.func @transform_2(%arg0: i32, %arg1: i32, %arg2: i32) -> (i32, i32, i32) {
    %c0_i32 = arith.constant 0 : i32
    %c0_i32_0 = arith.constant 0 : i32
    return %arg0, %arg1, %c0_i32 : i32, i32, i32
  }
  func.func @transform_3(%arg0: i32, %arg1: i32, %arg2: i32) -> (i32, i32, i32) {
    %c0_i32 = arith.constant 0 : i32
    %c0_i32_0 = arith.constant 0 : i32
    return %arg0, %arg1, %c0_i32 : i32, i32, i32
  }
}

</mosaic_0001>

<bundles_post_ra>
// kernel: tpu_custom_call.1
= control target key start
LH: loop header
LB: loop body
LE: loop exit
PB: predicated region body
PF: predicated region fallthrough
CT: control target
= control target key end

     0   :  { %9 = vsyncpa [#allocation3], 0  ;;  %s282_s0 = inlined_call_operand.hbm [shape: s32[8,256], index: 0, kind: input, shape index: {}]   ;;  %s283_s1 = inlined_call_operand.hbm [shape: s32[8,256], index: 1, kind: input, shape index: {}]   ;;  %s284_s2 = inlined_call_operand.hbm [shape: s32[1,8,256], index: 2, kind: output, shape index: {0}]   ;;  %s285_s3 = inlined_call_operand.hbm [shape: s32[1,8,256], index: 3, kind: output, shape index: {1}]  }
   0x1   :  { %10 = vsyncpa [#allocation6], 0 }
   0x2   :  { %11 = vsyncpa [#allocation4], 0 }
   0x3   :  { %12 = vsyncpa [#allocation9], 0  ;;  %s210_s12 = smov [#allocation2]   ;;  %s211_s14 = smov [#allocation5]  }
   0x4   :  { %s23_s13 = sshll.u32 %s210_s12, 4  ;;  %s37_s15 = sshll.u32 %s211_s14, 4  ;;  %s24_s13 = int_to_ptr.vmem [resolvable:$true] %s23_s13  ;;  %s38_s15 = int_to_ptr.vmem [resolvable:$true] %s37_s15 }
   0x5   :  { %s114_s18 = scalar_lea.hbm %s282_s0, 256 }
   0x6   :  { %p115_p0 = scmp.ne.s32.totalorder %s282_s0, %s114_s18  ;;  %p118_p1 = scmp.lt.u32.totalorder %s114_s18, %s282_s0 }
   0x8   :  { %p120_p2 = pnand %p118_p1, %p115_p0 }
   0xa   :  { %123 = shalt.err (!%p120_p2)
}
   0xb   :  { %s124_s23 = scalar_lea.vmem %s24_s13, 256  ;;  %p129_p4 = scmp.lt.s32.totalorder %s24_s13, %s24_s13 }
   0xc   :  { %p125_p3 = scmp.ne.s32.totalorder %s24_s13, %s124_s23  ;;  %p130_p5 = scmp.lt.s32.totalorder %s124_s23, %s124_s23 }
   0xe   :  { %p131_p6 = por %p130_p5, %p129_p4 }
  0x10   :  { %p132_p7 = pnand %p131_p6, %p125_p3 }
  0x12   :  { %135 = shalt.err (!%p132_p7)
}
  0x13   :  { %26 = dma.hbm_to_vmem [thread:$0]  %s282_s0, 256, %s24_s13, [#allocation3]  }
  0x14   :  { %s136_s28 = scalar_lea.hbm %s283_s1, 256 }
  0x15   :  { %p137_p8 = scmp.ne.s32.totalorder %s283_s1, %s136_s28  ;;  %p140_p9 = scmp.lt.u32.totalorder %s136_s28, %s283_s1 }
  0x17   :  { %p142_p10 = pnand %p140_p9, %p137_p8 }
  0x19   :  { %145 = shalt.err (!%p142_p10)
}
  0x1a   :  { %s146_s6 = scalar_lea.vmem %s38_s15, 256  ;;  %p151_p12 = scmp.lt.s32.totalorder %s38_s15, %s38_s15 }
  0x1b   :  { %p147_p11 = scmp.ne.s32.totalorder %s38_s15, %s146_s6  ;;  %p152_p13 = scmp.lt.s32.totalorder %s146_s6, %s146_s6 }
  0x1d   :  { %p153_p0 = por %p152_p13, %p151_p12 }
  0x1f   :  { %p154_p1 = pnand %p153_p0, %p147_p11 }
  0x21   :  { %157 = shalt.err (!%p154_p1)
}
  0x22   :  { %40 = dma.hbm_to_vmem [thread:$0]  %s283_s1, 256, %s38_s15, [#allocation6]  }
  0x23   :  { %202 = dma.done.wait [#allocation3], 256  }
  0x24   :  { %203 = vsyncadd [#allocation3], 4294967040 }
  0x25   :  { %204 = dma.done.wait [#allocation6], 256  }
  0x26   :  { %205 = vsyncadd [#allocation6], 4294967040  ;;  %v59_v0 = vld [vmem:[#allocation2] sm:$0xff]  ;;  %v61_v1 = vld [vmem:[#allocation5] sm:$0xff]  ;;  %s212_s8 = smov [#allocation7]   ;;  %s213_s10 = smov [#allocation8]  }
  0x27   :  { %v60_v2 = vld [vmem:[#allocation2 + $0x8] sm:$0xff]  ;;  %v63_v3 = vand.u32 %v61_v1, %v59_v0  ;;  %v62_v4 = vld [vmem:[#allocation5 + $0x8] sm:$0xff]  ;;  %v65_v5 = vor.u32 %v61_v1, %v59_v0  ;;  %s85_s9 = sshll.u32 %s212_s8, 4  ;;  %s95_s11 = sshll.u32 %s213_s10, 4  ;;  %s86_s9 = int_to_ptr.vmem [resolvable:$true] %s85_s9  ;;  %s96_s11 = int_to_ptr.vmem [resolvable:$true] %s95_s11 }
  0x28   :  { %v64_v6 = vand.u32 %v62_v4, %v60_v2  ;;  %v66_v7 = vor.u32 %v62_v4, %v60_v2  ;;  %s158_s1 = scalar_lea.vmem %s86_s9, 256  ;;  %p163_p3 = scmp.lt.s32.totalorder %s86_s9, %s86_s9 }
  0x29   :  { %71 = vst [vmem:[#allocation7] sm:$0xff] %v63_v3  ;;  %77 = vst [vmem:[#allocation8] sm:$0xff] %v65_v5  ;;  %p159_p2 = scmp.ne.s32.totalorder %s86_s9, %s158_s1  ;;  %p164_p4 = scmp.lt.s32.totalorder %s158_s1, %s158_s1 }
  0x2a   :  { %72 = vst [vmem:[#allocation7 + $0x8] sm:$0xff] %v64_v6  ;;  %78 = vst [vmem:[#allocation8 + $0x8] sm:$0xff] %v66_v7 }
  0x2b   :  { %p165_p5 = por %p164_p4, %p163_p3 }
  0x2d   :  { %p166_p6 = pnand %p165_p5, %p159_p2 }
  0x2f   :  { %169 = shalt.err (!%p166_p6)
}
  0x30   :  { %s170_s14 = scalar_lea.hbm %s284_s2, 256 }
  0x31   :  { %p171_p7 = scmp.ne.s32.totalorder %s284_s2, %s170_s14  ;;  %p174_p8 = scmp.lt.u32.totalorder %s170_s14, %s284_s2 }
  0x33   :  { %p176_p9 = pnand %p174_p8, %p171_p7 }
  0x35   :  { %179 = shalt.err (!%p176_p9)
}
  0x36   :  { %88 = dma.vmem_to_hbm [thread:$0]  %s86_s9, 256, %s284_s2, [#allocation4]  }
  0x37   :  { %s180_s21 = scalar_lea.vmem %s96_s11, 256  ;;  %p185_p11 = scmp.lt.s32.totalorder %s96_s11, %s96_s11 }
  0x38   :  { %p181_p10 = scmp.ne.s32.totalorder %s96_s11, %s180_s21  ;;  %p186_p12 = scmp.lt.s32.totalorder %s180_s21, %s180_s21 }
  0x3a   :  { %p187_p13 = por %p186_p12, %p185_p11 }
  0x3c   :  { %p188_p0 = pnand %p187_p13, %p181_p10 }
  0x3e   :  { %191 = shalt.err (!%p188_p0)
}
  0x3f   :  { %s192_s24 = scalar_lea.hbm %s285_s3, 256 }
  0x40   :  { %p193_p1 = scmp.ne.s32.totalorder %s285_s3, %s192_s24  ;;  %p196_p2 = scmp.lt.u32.totalorder %s192_s24, %s285_s3 }
  0x42   :  { %p198_p3 = pnand %p196_p2, %p193_p1 }
  0x44   :  { %201 = shalt.err (!%p198_p3)
}
  0x45   :  { %98 = dma.vmem_to_hbm [thread:$0]  %s96_s11, 256, %s285_s3, [#allocation9]  }
  0x46   :  { %206 = dma.done.wait [#allocation4], 256  }
  0x47   :  { %207 = vsyncadd [#allocation4], 4294967040 }
  0x48   :  { %208 = dma.done.wait [#allocation9], 256  }
  0x49   :  { %209 = vsyncadd [#allocation9], 4294967040 }
  0x4a   :  { %105 = vsyncpa [#allocation3], 1 }
  0x4b   :  { %106 = vsyncpa [#allocation6], 1 }
  0x4c   :  { %107 = vsyncpa [#allocation4], 1 }
  0x4d   :  { %108 = vsyncpa [#allocation9], 1 }

</bundles_post_ra>
